<compile_context>
chip_gen: v5e
topology: v5e:2x2
jax: 0.10.0
libtpu: 0.0.40
codegen_flags: <defaults>
</compile_context>

<pallas_src>
import functools

import numpy as np
import jax
import jax.numpy as jnp
from jax.experimental import pallas as pl
from jax.experimental.pallas import tpu as pltpu

_TWO_PI = float(2.0 * np.pi)
_HALF_PI = float(np.pi / 2.0)


def _fourier_kernel(x_ref, w_ref, phase_ref, out_ref, *, num_input_channels):
    # x_ref: (bm, C)   w_ref: (C, C+2M)   phase_ref: (1, C+2M)   out_ref: (bm, C+2M)
    x = x_ref[...]
    # One matmul places every Fourier column at its final (lane-aligned) position.
    pre = jnp.dot(x, w_ref[...], preferred_element_type=jnp.float32)
    # Scale after the dot (matches reference op order); the +pi/2 phase row turns
    # the last M columns into cosines: cos(t) = sin(t + pi/2).  Single sin pass.
    arg = _TWO_PI * pre + phase_ref[...]
    out_ref[...] = jnp.sin(arg).astype(out_ref.dtype)
    # Bit-exact pass-through of the raw input into the first C columns
    # (tiny masked store at lane offset 0; overwrites the placeholder columns).
    out_ref[:, 0:num_input_channels] = x.astype(out_ref.dtype)


def fourier_feature_transform(x, B, *, block_rows=None, out_dtype=None):
    """x: [batches, C], B: [C, M]  ->  [batches, C + 2*M]  (= cat[x, sin, cos])."""
    batches, C = x.shape
    C_b, M = B.shape
    assert C == C_b, f"Expected input to have {C_b} channels (got {C} channels)"
    N = C + 2 * M
    out_dtype = x.dtype if out_dtype is None else np.dtype(out_dtype)

    # W = [0 | B | B]: the leading zero block is a placeholder for the x
    # pass-through columns (overwritten in-kernel with the exact input).
    W = jnp.concatenate([jnp.zeros((C, C), B.dtype), B, B], axis=1)          # (C, N)
    phase = jnp.concatenate(
        [jnp.zeros((1, C + M), jnp.float32),
         jnp.full((1, M), _HALF_PI, dtype=jnp.float32)], axis=1)             # (1, N)

    # ---- batch-tile selection --------------------------------------------------
    if block_rows is None:
        out_row_bytes = N * np.dtype(out_dtype).itemsize
        # Keep the double-buffered output block under ~16 MiB of VMEM (auto-shrinks
        # the row tile for large mapping_size; fits v7x's 64 MiB VMEM comfortably).
        vmem_cap_rows = max(8, ((16 * 1024 * 1024) // (2 * out_row_bytes)) // 8 * 8)
        block_rows = min(1024, vmem_cap_rows)
        # Keep >=2 grid steps so a megacore (v7x: 2 TCs) can shard the batch axis.
        if batches > 8:
            block_rows = min(block_rows, max(8, ((batches // 2) // 8) * 8))
    block_rows = max(8, int(block_rows))
    block_rows = min(block_rows, max(8, ((batches + 7) // 8) * 8))
    grid = (pl.cdiv(batches, block_rows),)  # ragged last tile handled by Pallas

    kernel = functools.partial(_fourier_kernel, num_input_channels=C)
    return pl.pallas_call(
        kernel,
        out_shape=jax.ShapeDtypeStruct((batches, N), out_dtype),
        grid_spec=pltpu.PrefetchScalarGridSpec(
            num_scalar_prefetch=0,
            grid=grid,
            in_specs=[
                pl.BlockSpec((block_rows, C), lambda i: (i, 0)),   # x row tile
                pl.BlockSpec((C, N), lambda i: (0, 0)),            # W resident
                pl.BlockSpec((1, N), lambda i: (0, 0)),            # phase resident
            ],
            out_specs=pl.BlockSpec((block_rows, N), lambda i: (i, 0)),
        ),
        compiler_params=pltpu.CompilerParams(
            dimension_semantics=("parallel",),
            # Explicit scoped-VMEM budget (safe on v5e/v6e/v7x; well above the
            # ~<=20 MiB the chosen tiles can need).
            vmem_limit_bytes=48 * 1024 * 1024,
        ),
    )(x, W, phase)


def make_B(key, num_input_channels, mapping_size, scale):
    """Reproduce the module's __init__: B = randn(C, M) * scale, rows sorted
    ascending by L2 norm."""
    B = jax.random.normal(key, (num_input_channels, mapping_size), jnp.float32) * scale
    order = jnp.argsort(jnp.linalg.norm(B, axis=1))
    return B[order]


if __name__ == "__main__":
    # Small shapes consistent with forward(): x is [batches, num_input_channels].
    batches = 16
    num_input_channels = 4
    mapping_size = 256
    scale = 10.0

    key = jax.random.PRNGKey(0)
    k_b, k_x = jax.random.split(key)
    B = make_B(k_b, num_input_channels, mapping_size, scale)
    x = jax.random.normal(k_x, (batches, num_input_channels), dtype=jnp.float32)

    fn = jax.jit(fourier_feature_transform)
    out = jax.block_until_ready(fn(x, B))
    assert out.shape == (batches, num_input_channels + 2 * mapping_size)

    # Reference: same math as the PyTorch forward.
    res = 2.0 * np.pi * (x @ B)
    ref = jnp.concatenate([x, jnp.sin(res), jnp.cos(res)], axis=1)
    out_np, ref_np = np.asarray(out), np.asarray(ref)

    # The x pass-through columns are copied bit-exactly.
    np.testing.assert_array_equal(out_np[:, :num_input_channels], np.asarray(x))
    # |res| reaches ~500 here (scale=10), so a half-ulp argument perturbation
    # (cos computed as sin(res + pi/2)) already moves a value by ~3e-5; 5e-4
    # still verifies ~4 significant digits of the Fourier features.
    np.testing.assert_allclose(out_np, ref_np, rtol=1e-4, atol=5e-4)

    # Ragged batch (not a multiple of the row tile) exercises the cdiv grid path.
    x2 = jax.random.normal(jax.random.PRNGKey(1), (20, num_input_channels), jnp.float32)
    out2 = jax.block_until_ready(fn(x2, B))
    res2 = 2.0 * np.pi * (x2 @ B)
    ref2 = jnp.concatenate([x2, jnp.sin(res2), jnp.cos(res2)], axis=1)
    np.testing.assert_allclose(np.asarray(out2), np.asarray(ref2), rtol=1e-4, atol=5e-4)

    print("KERNEL_OK")
</pallas_src>

<mosaic_0001>
module attributes {stable_mosaic.version = 11 : i64} {
  func.func @_fourier_kernel(%arg0: i32, %arg1: memref<8x4xf32, #tpu.memory_space<vmem>>, %arg2: memref<4x516xf32, #tpu.memory_space<vmem>>, %arg3: memref<1x516xf32, #tpu.memory_space<vmem>>, %arg4: memref<8x516xf32, #tpu.memory_space<vmem>>) attributes {dimension_semantics = [#tpu.dimension_semantics<parallel>], iteration_bounds = array<i64: 2>, scalar_prefetch = 0 : i64, scratch_operands = 0 : i64, tpu.core_type = #tpu.core_type<tc>, window_params = [{transform_indices = @transform_0, window_bounds = array<i64: 8, 4>}, {pipeline_mode = #tpu.pipeline_mode<synchronous>, transform_indices = @transform_1, window_bounds = array<i64: 4, 516>}, {pipeline_mode = #tpu.pipeline_mode<synchronous>, transform_indices = @transform_2, window_bounds = array<i64: 1, 516>}, {transform_indices = @transform_3, window_bounds = array<i64: 8, 516>}]} {
    %c0 = arith.constant 0 : index
    %c0_0 = arith.constant 0 : index
    %0 = vector.load %arg1[%c0, %c0_0] : memref<8x4xf32, #tpu.memory_space<vmem>>, vector<8x4xf32>
    %c0_1 = arith.constant 0 : index
    %c0_2 = arith.constant 0 : index
    %1 = vector.load %arg2[%c0_1, %c0_2] : memref<4x516xf32, #tpu.memory_space<vmem>>, vector<4x516xf32>
    %cst = arith.constant dense<0.000000e+00> : vector<8x516xf32>
    %2 = tpu.matmul %0, %1, %cst {dimension_numbers = #tpu.dot_dimension_numbers<[1], [0], [0], [1], [0, 0, 1, 1], [], []>} : vector<8x4xf32>, vector<4x516xf32>, vector<8x516xf32> -> vector<8x516xf32>
    %cst_3 = arith.constant 6.28318548 : f32
    %3 = vector.broadcast %cst_3 : f32 to vector<8x516xf32>
    %4 = arith.mulf %3, %2 : vector<8x516xf32>
    %c0_4 = arith.constant 0 : index
    %c0_5 = arith.constant 0 : index
    %5 = vector.load %arg3[%c0_4, %c0_5] : memref<1x516xf32, #tpu.memory_space<vmem>>, vector<1x516xf32>
    %6 = vector.broadcast %5 : vector<1x516xf32> to vector<8x516xf32>
    %7 = arith.addf %4, %6 : vector<8x516xf32>
    %8 = math.sin %7 : vector<8x516xf32>
    %c0_6 = arith.constant 0 : index
    %c0_7 = arith.constant 0 : index
    %9 = vector.load %arg4[%c0_6, %c0_7] : memref<8x516xf32, #tpu.memory_space<vmem>>, vector<8x516xf32>
    tpu.vector_store %arg4[%c0_6, %c0_7], %8 {strides = array<i32>} : memref<8x516xf32, #tpu.memory_space<vmem>>, vector<8x516xf32>,
    %c0_8 = arith.constant 0 : index
    %c0_9 = arith.constant 0 : index
    %10 = vector.load %arg4[%c0_8, %c0_9] : memref<8x516xf32, #tpu.memory_space<vmem>>, vector<8x4xf32>
    tpu.vector_store %arg4[%c0_8, %c0_9], %0 {strides = array<i32>} : memref<8x516xf32, #tpu.memory_space<vmem>>, vector<8x4xf32>,
    return
  }
  func.func @transform_0(%arg0: i32) -> (i32, i32) {
    %c0_i32 = arith.constant 0 : i32
    %c0_i32_0 = arith.constant 0 : i32
    return %arg0, %c0_i32 : i32, i32
  }
  func.func @transform_1(%arg0: i32) -> (i32, i32) {
    %c0_i32 = arith.constant 0 : i32
    %c0_i32_0 = arith.constant 0 : i32
    %c0_i32_1 = arith.constant 0 : i32
    return %c0_i32, %c0_i32_0 : i32, i32
  }
  func.func @transform_2(%arg0: i32) -> (i32, i32) {
    %c0_i32 = arith.constant 0 : i32
    %c0_i32_0 = arith.constant 0 : i32
    %c0_i32_1 = arith.constant 0 : i32
    return %c0_i32, %c0_i32_0 : i32, i32
  }
  func.func @transform_3(%arg0: i32) -> (i32, i32) {
    %c0_i32 = arith.constant 0 : i32
    %c0_i32_0 = arith.constant 0 : i32
    return %arg0, %c0_i32 : i32, i32
  }
}

</mosaic_0001>

<bundles_post_ra>
// kernel: fourier_feature_transform.1
= control target key start
LH: loop header
LB: loop body
LE: loop exit
PB: predicated region body
PF: predicated region fallthrough
CT: control target
= control target key end

     0   :  { %8 = vsyncpa [#allocation3], 0  ;;  %s1991_s0 = inlined_call_operand.vmem [shape: f32[16,4], index: 0, kind: input, shape index: {}]   ;;  %s1992_s1 = inlined_call_operand.vmem [shape: f32[4,516], index: 1, kind: input, shape index: {}]   ;;  %s1993_s2 = inlined_call_operand.vmem [shape: f32[1,516], index: 2, kind: input, shape index: {}]   ;;  %s1994_s3 = inlined_call_operand.hbm [shape: f32[16,516], index: 3, kind: output, shape index: {}]  }
   0x1   :  { %10 = vsyncpa [#allocation3 + $0x1], 0  ;;  %s1349_s12 = smov 0   ;;  %s1351_s13 = smov 0  }
   0x2   :  { %s1353_s14 = smov 0   ;;  %s1355_s15 = smov 0  }
   0x3 LB: > { %s1370_s16 = sadd.s32 4294967295, %s1320_s15   ;;  %s1177_s17 = sadd.s32 4294967294, %s1320_s15   ;;  %s1320_s15 = sphi %s1355_s15, %s2008_s15   ;;  %s1316_s14 = sphi %s1353_s14, %s2007_s14   ;;  %s1312_s13 = sphi %s1351_s13, %s2006_s13   ;;  %s1308_s12 = sphi %s1349_s12, %s2005_s12  }
   0x4   : > { %s1374_s18 = sadd.s32 1, %s1320_s15   ;;  %s91_s19 = sadd.s32 1, %s1316_s14 }
   0x5   : > { %s88_s20 = ssub.s32 %s1320_s15, %s1374_s18  ;;  %p101_p0 = scmp.ne.s32.totalorder %s1316_s14, %s1312_s13 }
   0x6   : > { %p89_p1 = scmp.eq.s32.totalorder %s88_s20, 0  ;;  %p102_p2 = scmp.eq.s32.totalorder %s1370_s16, 1 }
   0x7   : > { %p107_p3 = scmp.ne.s32.totalorder %s1312_s13, %s1308_s12  ;;  %p108_p4 = scmp.eq.s32.totalorder %s1177_s17, 1 }
   0x8   : > { %s1385_s21 = scalar_select %p89_p1, %s1316_s14, %s91_s19  }
   0x9   : > { %p1387_p5 = por %p102_p2, %p101_p0  ;;  %p1391_p6 = por %p108_p4, %p107_p3 }
   0xa   : > { %p1180_p7 = scmp.ge.s32.totalorder %s1320_s15, 1  ;;  %p139_p8 = scmp.lt.s32.totalorder %s1320_s15, 3 }
   0xc   : > { %p140_p9 = pnand %p1180_p7, %p139_p8 }
   0xd   : > { %p162_p10 = scmp.lt.s32.totalorder (!%p140_p9), %s1370_s16, 1  ;;  %s159_s10 = sand.u32 (!%p140_p9), 1, %s1312_s13  }
   0xe   : > { %143 = sbr.rel (%p140_p9) target bundleno = 393 (0x189), region = 32  ;;  %s1278_s5 = scalar_lea.hbm (!%p140_p9), %s1994_s3, 80 }
   0xf   : > { %s1210_s11 = smul.u32 (!%p140_p9), 40, %s159_s10 }
  0x10   : > { %s1211_s19 = smul.u32 (!%p140_p9), 40, %s1370_s16 }
  0x11   : > { %s1750_s17 = scalar_lea.vmem (!%p140_p9), [#allocation2], %s1210_s11 }
  0x12   : > { %s1113_s25 = scalar_lea.hbm (!%p140_p9), %s1994_s3, %s1211_s19  ;;  %s1115_s26 = sshll.u32 (!%p140_p9), %s1750_s17, 4  ;;  %s1116_s26 = int_to_ptr.vmem [resolvable:$true] %s1115_s26 }
  0x13   : > { %v167_v0 = vld [vmem:[%s1992_s1] sm:$0xff]  ;;  %v168_v1 = vld [vmem:[%s1992_s1 + $0x8] sm:$0xff]  ;;  %v169_v2 = vld [vmem:[%s1992_s1 + $0x10] sm:$0xf]  ;;  %s163_s30 = scalar_select %p162_p10, %s1370_s16, 1  ;;  %vm187_vm0 = vcmask 1043456  }
  0x14   : > { %173 = vst [vmem:[#allocation1] ss:$2 sm:$0xff] %v167_v0  ;;  %vm183_vm1 = vcmask 31744   ;;  %v1431_v9 = vld [vmem:[%s1993_s2] sm:$0x1f]  ;;  %s1117_s27 = sshll.u32 %s1113_s25, 4  ;;  %s1118_s27 = int_to_ptr.hbm [resolvable:$true] %s1117_s27 }
  0x15   : > { %175 = vst [vmem:[#allocation1 + $0x10] ss:$2 sm:$0xff] %v168_v1  ;;  %s1181_s4 = sshll.u32 %s163_s30, 3  ;;  %v305_v10 = vperm.slane %v1431_v9, 0  ;;  %v306_v11 = vperm.slane %v1431_v9, 1  ;;  %v307_v34 = vperm.slane %v1431_v9, 2 }
  0x16   : > { %177 = vst [vmem:[#allocation1 + $0x20] ss:$2 sm:$0xff] %v169_v2  ;;  %s165_s7 = scalar_lea.vmem %s1991_s0, %s1181_s4  ;;  %v1322_v46 = vmov 683565275   ;;  %v1323_v48 = vmov 2475754826  }
  0x17   : > { %v1411_v3 = vld [vmem:[%s165_s7] sm:$0xff]  ;;  %v1324_v52 = vmov 2131351028   ;;  %v1325_v55 = vmov 2102212464   ;;  %s1102_s16 = scalar_lea.sflag [#allocation3], %s159_s10 }
  0x18   : > { %v1326_v58 = vmov 920167782   ;;  %v1327_v61 = vmov 1326507024   ;;  %s1272_s28 = sshra.s32 %s1118_s27, 4  ;;  %s1273_s28 = int_to_ptr.hbm [resolvable:$true] %s1272_s28 }
  0x19   : > { %s1274_s29 = scalar_lea.hbm %s1273_s28, 40  ;;  %p1279_p0 = scmp.lt.s32.totalorder %s1273_s28, %s1994_s3 }
  0x1a   : > { %p1275_p11 = scmp.ne.s32.totalorder %s1273_s28, %s1274_s29  ;;  %p1280_p1 = scmp.lt.s32.totalorder %s1278_s5, %s1274_s29 }
  0x1b   : > { %v178_v4 = vld.sshfl [vmem:[#allocation1] sm:$0xff pattern:$0x75316420]  ;;  %v179_v5 = vld.sshfl [vmem:[#allocation1 + $0x8] sm:$0xff pattern:$0x75316420] }
  0x1c   : > { %1182 = vmatpush.msk.msra.mxu0 %vm187_vm0, %v178_v4  ;;  %1184 = vmatpush.msk.msra.mxu1 %vm187_vm0, %v179_v5  ;;  %v180_v6 = vld.sshfl [vmem:[#allocation1 + $0x10] sm:$0xff pattern:$0x75316420]  ;;  %v181_v7 = vld.sshfl [vmem:[#allocation1 + $0x18] sm:$0xff pattern:$0x75316420]  ;;  %p1276_p12 = pnand %p1275_p11, %p1387_p5  ;;  %p1281_p2 = por %p1280_p1, %p1279_p0 }
  0x1d   : > { %1186 = vmatpush.msk.msra.mxu2 %vm187_vm0, %v180_v6  ;;  %1188 = vmatpush.msk.msra.mxu3 %vm187_vm0, %v181_v7  ;;  %v182_v8 = vld.sshfl [vmem:[#allocation1 + $0x20] sm:$0xff pattern:$0x75316420] }
  0x1e   : > { %1183 = vmatmul.msk.f32.vlgmr.msra.gmra.mxu0 %vm183_vm1, %v1411_v3  ;;  %1185 = vmatmul.msk.f32.vlgmr.msra.gmra.mxu1 %vm183_vm1, %v1411_v3  ;;  %p1277_p13 = pneg %p1276_p12 }
  0x1f   : > { %1187 = vmatmul.msk.f32.vlgmr.msra.gmra.mxu2 %vm183_vm1, %v1411_v3  ;;  %1189 = vmatmul.msk.f32.vlgmr.msra.gmra.mxu3 %vm183_vm1, %v1411_v3 }
  0x20   : > { %1190 = vmatpush.msk.msrb.mxu0 %vm187_vm0, %v182_v8  ;;  %p1282_p3 = pnand %p1281_p2, %p1277_p13 }
  0x26   : > { %1191 = vmatmul.msk.f32.vlgmr.msrb.gmra.mxu0 %vm183_vm1, %v1411_v3 }
  0x9b   : > { %v215_v12 = vpop.f32.mrf.mxu0  ;;  %v235_v13 = vpop.f32.mrf.mxu1 }
  0x9c   : > { %v298_v14 = vmul.f32 6.2831855, %v215_v12  ;;  %v299_v15 = vmul.f32 6.2831855, %v235_v13 }
  0x9e   : > { %v1435_v16 = vadd.f32 %v305_v10, %v298_v14  ;;  %v1437_v17 = vadd.f32 %v306_v11, %v299_v15 }
  0xa0   : > { %v320_v18 = vand.u32 2147483647, %v1435_v16  ;;  %v323_v19 = vand.u32 2139095040, %v1435_v16  ;;  %v475_v20 = vand.u32 2147483647, %v1437_v17  ;;  %v478_v21 = vand.u32 2139095040, %v1437_v17 }
  0xa2   : > { %v324_v22 = vshrl.u32 %v323_v19, 23  ;;  %v327_v23 = vand.u32 8388607, %v320_v18  ;;  %v479_v24 = vshrl.u32 %v478_v21, 23  ;;  %v482_v25 = vand.u32 8388607, %v475_v20  ;;  %v255_v28 = vpop.f32.mrf.mxu2 }
  0xa3   : > { %v300_v33 = vmul.f32 6.2831855, %v255_v28 }
  0xa4   : > { %v1192_v26 = vadd.s32 4294967169, %v324_v22  ;;  %v328_v27 = vor.u32 8388608, %v327_v23  ;;  %v1195_v29 = vadd.s32 4294967169, %v479_v24  ;;  %v483_v30 = vor.u32 8388608, %v482_v25 }
  0xa5   : > { %v1452_v40 = vadd.f32 %v307_v34, %v300_v33 }
  0xa6   : > { %v330_v31 = vadd.s32 1, %v1192_v26  ;;  %v485_v32 = vadd.s32 1, %v1195_v29  ;;  %v1448_v35 = vshll.u32 %v328_v27, 8  ;;  %v1450_v37 = vshll.u32 %v483_v30, 8 }
  0xa8   : > { %vm331_vm2 = vcmp.gt.s32.totalorder %v330_v31, 0  ;;  %vm486_vm3 = vcmp.gt.s32.totalorder %v485_v32, 0  ;;  %v1455_v42 = vand.u32 65535, %v1448_v35  ;;  %v1458_v43 = vshrl.u32 %v1448_v35, 16 }
  0xa9   : > { %v332_v36 = vsel %vm331_vm2, %v330_v31, 0  ;;  %v487_v39 = vsel %vm486_vm3, %v485_v32, 0  ;;  %v1467_v50 = vand.u32 65535, %v1450_v37 }
  0xaa   : > { %v334_v38 = vand.u32 31, %v332_v36  ;;  %v1460_v44 = vand.u32 31, %v487_v39  ;;  %v1462_v45 = vshrl.u32 %v332_v36, 5  ;;  %v1509_v31 = vshrl.u32 %v487_v39, 5 }
  0xac   : > { %v335_v41 = vsub.s32 32, %v334_v38  ;;  %v337_v47 = vshll.u32 %v1322_v46, %v334_v38  ;;  %v340_v49 = vshll.u32 %v1323_v48, %v334_v38  ;;  %v343_v54 = vshll.u32 %v1324_v52, %v334_v38 }
  0xad   : > { %v346_v57 = vshll.u32 %v1325_v55, %v334_v38  ;;  %v349_v60 = vshll.u32 %v1326_v58, %v334_v38  ;;  %v1478_v2 = vsub.s32 32, %v1460_v44  ;;  %vm352_vm4 = vcmp.lt.s32.totalorder %v1462_v45, 1 }
  0xae   : > { %v338_v51 = vshrl.u32 %v1323_v48, %v335_v41  ;;  %v341_v53 = vshrl.u32 %v1324_v52, %v335_v41  ;;  %v344_v56 = vshrl.u32 %v1325_v55, %v335_v41  ;;  %v347_v59 = vshrl.u32 %v1326_v58, %v335_v41 }
  0xaf   : > { %v350_v62 = vshrl.u32 %v1327_v61, %v335_v41  ;;  %vm353_vm5 = vcmp.lt.s32.totalorder %v1462_v45, 2  ;;  %vm354_vm6 = vcmp.lt.s32.totalorder %v1462_v45, 3  ;;  %vm355_vm7 = vcmp.lt.s32.totalorder %v1462_v45, 4 }
  0xb0   : > { %v339_v63 = vor.u32 %v338_v51, %v337_v47  ;;  %v342_v0 = vor.u32 %v341_v53, %v340_v49  ;;  %v345_v1 = vor.u32 %v344_v56, %v343_v54  ;;  %v348_v4 = vor.u32 %v347_v59, %v346_v57 }
  0xb1   : > { %v351_v5 = vor.u32 %v350_v62, %v349_v60  ;;  %v492_v11 = vshll.u32 %v1322_v46, %v1460_v44  ;;  %v495_v12 = vshll.u32 %v1323_v48, %v1460_v44  ;;  %v493_v19 = vshrl.u32 %v1323_v48, %v1478_v2 }
  0xb2   : > { %v360_v6 = vsel %vm352_vm4, %v339_v63, %v342_v0  ;;  %v364_v7 = vsel %vm352_vm4, %v342_v0, %v345_v1  ;;  %v361_v8 = vsel %vm355_vm7, %v348_v4, 920167782  ;;  %v357_v13 = vsel %vm355_vm7, %v345_v1, 2102212464 }
  0xb3   : > { %v365_v10 = vsel %vm355_vm7, %v351_v5, 1326507024  ;;  %v362_v14 = vsel %vm354_vm6, %v345_v1, %v361_v8  ;;  %v336_v21 = vshrl.u32 %v1322_v46, %v335_v41  ;;  %v496_v24 = vshrl.u32 %v1324_v52, %v1478_v2 }
  0xb4   : > { %v366_v15 = vsel %vm354_vm6, %v348_v4, %v365_v10  ;;  %v363_v22 = vsel %vm353_vm5, %v360_v6, %v362_v14  ;;  %v358_v30 = vsel %vm354_vm6, %v342_v0, %v357_v13  ;;  %v1511_v32 = vor.u32 %v493_v19, %v492_v11 }
  0xb5   : > { %v367_v23 = vsel %vm353_vm5, %v364_v7, %v366_v15  ;;  %v393_v27 = vand.u32 65535, %v363_v22  ;;  %v394_v28 = vshrl.u32 %v363_v22, 16  ;;  %v356_v29 = vsel %vm352_vm4, %v336_v21, %v339_v63 }
  0xb6   : > { %v371_v25 = vand.u32 65535, %v367_v23  ;;  %v372_v26 = vshrl.u32 %v367_v23, 16  ;;  %v1515_v36 = vor.u32 %v496_v24, %v495_v12  ;;  %v498_v38 = vshll.u32 %v1324_v52, %v1460_v44 }
  0xb7   : > { %v396_v47 = vmul.u32 %v394_v28, %v1455_v42  ;;  %v397_v49 = vmul.u32 %v393_v27, %v1458_v43  ;;  %v499_v39 = vshrl.u32 %v1325_v55, %v1478_v2  ;;  %v395_v54 = vmul.u32 %v393_v27, %v1455_v42 }
  0xb8   : > { %v374_v33 = vmul.u32 %v372_v26, %v1455_v42  ;;  %v375_v34 = vmul.u32 %v371_v25, %v1458_v43  ;;  %v373_v41 = vmul.u32 %v371_v25, %v1455_v42  ;;  %v376_v51 = vmul.u32 %v372_v26, %v1458_v43 }
  0xb9   : > { %v398_v56 = vmul.u32 %v394_v28, %v1458_v43  ;;  %v399_v62 = vshll.u32 %v396_v47, 16  ;;  %v401_v0 = vshll.u32 %v397_v49, 16  ;;  %v501_v1 = vshll.u32 %v1325_v55, %v1460_v44 }
  0xba   : > { %v377_v53 = vshll.u32 %v374_v33, 16  ;;  %v378_v57 = vshrl.u32 %v374_v33, 16  ;;  %v379_v59 = vshll.u32 %v375_v34, 16  ;;  %v380_v60 = vshrl.u32 %v375_v34, 16 }
  0xbb   : > { %v1328_v4 = vmov 0   ;;  %vm403_vm9 = vc.u32 %v395_v54, %v399_v62  ;;  %v405_v6 = vadd.s32 %v399_v62, %v395_v54  ;;  %v502_v42 = vshrl.u32 %v1326_v58, %v1478_v2 }
  0xbc   : > { %vm381_vm8 = vc.u32 %v373_v41, %v377_v53  ;;  %v383_v63 = vadd.s32 %v377_v53, %v373_v41  ;;  %v404_v43 = vsel %vm403_vm9, 1, %v1328_v4  ;;  %v504_v8 = vshll.u32 %v1326_v58, %v1460_v44 }
  0xbd   : > { %v382_v5 = vsel %vm381_vm8, 1, %v1328_v4  ;;  %v406_v11 = vadd.s32 %v404_v43, %v398_v56  ;;  %vm407_vm11 = vc.u32 %v405_v6, %v401_v0  ;;  %v500_v12 = vor.u32 %v499_v39, %v498_v38 }
  0xbe   : > { %v384_v7 = vadd.s32 %v382_v5, %v376_v51  ;;  %vm385_vm10 = vc.u32 %v383_v63, %v379_v59  ;;  %v408_v14 = vsel %vm407_vm11, 1, %v1328_v4  ;;  %v503_v15 = vor.u32 %v502_v42, %v501_v1 }
  0xbf   : > { %v386_v10 = vsel %vm385_vm10, 1, %v1328_v4  ;;  %v505_v19 = vshrl.u32 %v1327_v61, %v1478_v2  ;;  %v400_v21 = vshrl.u32 %v396_v47, 16  ;;  %v410_v22 = vadd.s32 %v408_v14, %v406_v11 }
  0xc0   : > { %v388_v13 = vadd.s32 %v386_v10, %v384_v7  ;;  %vm507_vm12 = vcmp.lt.s32.totalorder %v1509_v31, 1  ;;  %vm509_vm13 = vcmp.lt.s32.totalorder %v1509_v31, 3  ;;  %vm508_vm14 = vcmp.lt.s32.totalorder %v1509_v31, 2 }
  0xc1   : > { %v506_v44 = vor.u32 %v505_v19, %v504_v8  ;;  %vm510_vm15 = vcmp.lt.s32.totalorder %v1509_v31, 4  ;;  %v402_v24 = vshrl.u32 %v397_v49, 16  ;;  %v411_v25 = vadd.s32 %v410_v22, %v400_v21 }
  0xc2   : > { %v389_v23 = vadd.s32 %v388_v13, %v378_v57  ;;  %v515_v26 = vsel %vm507_vm12, %v1511_v32, %v1515_v36  ;;  %v516_v27 = vsel %vm510_vm15, %v503_v15, 920167782  ;;  %v1551_v33 = vadd.s32 %v405_v6, %v401_v0 }
  0xc3   : > { %v517_v34 = vsel %vm509_vm13, %v500_v12, %v516_v27  ;;  %v519_v38 = vsel %vm507_vm12, %v1515_v36, %v500_v12  ;;  %v359_v41 = vsel %vm353_vm5, %v356_v29, %v358_v30  ;;  %v412_v47 = vadd.s32 %v411_v25, %v402_v24 }
  0xc4   : > { %v1549_v28 = vadd.s32 %v389_v23, %v380_v60  ;;  %v518_v49 = vsel %vm508_vm14, %v515_v26, %v517_v34  ;;  %v520_v39 = vsel %vm510_vm15, %v506_v44, 1326507024  ;;  %v525_v53 = vshrl.u32 %v1450_v37, 16 }
  0xc5   : > { %v521_v51 = vsel %vm509_vm13, %v503_v15, %v520_v39  ;;  %v548_v54 = vand.u32 65535, %v518_v49  ;;  %v416_v56 = vadd.s32 1, %v412_v47  ;;  %v549_v29 = vshrl.u32 %v518_v49, 16 }
  0xc6   : > { %vm415_vm0 = vc.u32 %v1549_v28, %v1551_v33  ;;  %v522_v45 = vsel %vm508_vm14, %v519_v38, %v521_v51  ;;  %v633_v30 = vand.u32 2139095040, %v1452_v40  ;;  %v413_v57 = vmul.u32 %v1448_v35, %v359_v41 }
  0xc7   : > { %v526_v59 = vand.u32 65535, %v522_v45  ;;  %v527_v60 = vshrl.u32 %v522_v45, 16  ;;  %v417_v62 = vsel %vm415_vm0, %v416_v56, %v412_v47  ;;  %v491_v63 = vshrl.u32 %v1322_v46, %v1478_v2 }
  0xc8   : > { %v551_v0 = vmul.u32 %v549_v29, %v1467_v50  ;;  %v552_v1 = vmul.u32 %v548_v54, %v525_v53  ;;  %v418_v5 = vadd.s32 %v417_v62, %v413_v57  ;;  %v512_v6 = vsel %vm510_vm15, %v500_v12, 2102212464 }
  0xc9   : > { %v529_v42 = vmul.u32 %v527_v60, %v1467_v50  ;;  %v530_v7 = vmul.u32 %v526_v59, %v525_v53  ;;  %v550_v43 = vmul.u32 %v548_v54, %v1467_v50  ;;  %v553_v8 = vmul.u32 %v549_v29, %v525_v53 }
  0xca   : > { %v554_v35 = vshll.u32 %v551_v0, 16  ;;  %v634_v10 = vshrl.u32 %v633_v30, 23  ;;  %v419_v11 = vadd.s32 536870912, %v418_v5  ;;  %v528_v13 = vmul.u32 %v526_v59, %v1467_v50 }
  0xcb   : > { %v531_v14 = vmul.u32 %v527_v60, %v525_v53  ;;  %v532_v2 = vshll.u32 %v529_v42, 16  ;;  %v534_v15 = vshll.u32 %v530_v7, 16  ;;  %v556_v19 = vshll.u32 %v552_v1, 16 }
  0xcc   : > { %vm558_vm2 = vc.u32 %v550_v43, %v554_v35  ;;  %v560_v21 = vadd.s32 %v554_v35, %v550_v43  ;;  %v420_v22 = vshrl.u32 %v419_v11, 30  ;;  %vm322_vm4 = vcmp.lt.s32.totalorder %v1435_v16, 0 }
  0xcd   : > { %vm536_vm3 = vc.u32 %v528_v13, %v532_v2  ;;  %v538_v12 = vadd.s32 %v532_v2, %v528_v13  ;;  %v559_v23 = vsel %vm558_vm2, 1, %v1328_v4  ;;  %v511_v50 = vsel %vm507_vm12, %v491_v63, %v1511_v32 }
  0xce   : > { %v537_v44 = vsel %vm536_vm3, 1, %v1328_v4  ;;  %v561_v24 = vadd.s32 %v559_v23, %v553_v8  ;;  %vm562_vm5 = vc.u32 %v560_v21, %v556_v19  ;;  %v421_v25 = vshll.u32 %v420_v22, 30 }
  0xcf   : > { %v539_v26 = vadd.s32 %v537_v44, %v531_v14  ;;  %vm540_vm6 = vc.u32 %v538_v12, %v534_v15  ;;  %v513_v27 = vsel %vm509_vm13, %v1515_v36, %v512_v6  ;;  %v563_v38 = vsel %vm562_vm5, 1, %v1328_v4 }
  0xd0   : > { %v541_v34 = vsel %vm540_vm6, 1, %v1328_v4  ;;  %v1198_v41 = vadd.s32 4294967169, %v634_v10  ;;  %v422_v47 = vsub.s32 %v418_v5, %v421_v25  ;;  %v533_v49 = vshrl.u32 %v529_v42, 16 }
  0xd1   : > { %v543_v39 = vadd.s32 %v541_v34, %v539_v26  ;;  %v565_v51 = vadd.s32 %v563_v38, %v561_v24  ;;  %v444_v53 = vsub.s32 4, %v420_v22  ;;  %v555_v54 = vshrl.u32 %v551_v0, 16 }
  0xd2   : > { %v630_v56 = vand.u32 2147483647, %v1452_v40  ;;  %v640_v32 = vadd.s32 1, %v1198_v41  ;;  %vm423_vm7 = vcmp.lt.s32.totalorder %v422_v47, 0  ;;  %v424_v45 = vsub.s32 0, %v422_v47 }
  0xd3   : > { %v535_v29 = vshrl.u32 %v530_v7, 16  ;;  %v544_v30 = vadd.s32 %v543_v39, %v533_v49  ;;  %v514_v36 = vsel %vm508_vm14, %v511_v50, %v513_v27  ;;  %v557_v57 = vshrl.u32 %v552_v1, 16 }
  0xd4   : > { %v566_v59 = vadd.s32 %v565_v51, %v555_v54  ;;  %vm641_vm8 = vcmp.gt.s32.totalorder %v640_v32, 0  ;;  %v425_v60 = vsel %vm423_vm7, %v424_v45, %v422_v47  ;;  %v1597_v63 = vadd.s32 %v560_v21, %v556_v19 }
  0xd5   : > { %v1595_v62 = vadd.s32 %v544_v30, %v535_v29  ;;  %v642_v5 = vsel %vm641_vm8, %v640_v32, 0  ;;  %v426_v0 = vclz %v425_v60  ;;  %v445_v6 = vsel %vm322_vm4, %v444_v53, %v420_v22 }
  0xd6   : > { %v567_v42 = vadd.s32 %v566_v59, %v557_v57  ;;  %v644_v43 = vand.u32 31, %v642_v5  ;;  %vm1603_vm9 = vcmp.le.f32.partialorder %v320_v18, 0.7853982  ;;  %v414_v1 = vadd.s32 %v1551_v33, %v1549_v28  ;;  %v275_v57 = vpop.f32.mrf.mxu3 }
  0xd7   : > { %v1193_v7 = vadd.s32 4294967294, %v426_v0  ;;  %vm570_vm10 = vc.u32 %v1595_v62, %v1597_v63  ;;  %v447_v10 = vsel %vm1603_vm9, 0, %v445_v6  ;;  %v568_v11 = vmul.u32 %v1450_v37, %v514_v36 }
  0xd8   : > { %v571_v8 = vadd.s32 1, %v567_v42  ;;  %v645_v35 = vsub.s32 32, %v644_v43  ;;  %v637_v18 = vand.u32 8388607, %v630_v56  ;;  %v647_v13 = vshll.u32 %v1322_v46, %v644_v43 }
  0xd9   : > { %vm1194_vm11 = vcmp.lt.s32.totalorder %v1193_v7, 0  ;;  %v650_v28 = vshll.u32 %v1323_v48, %v644_v43  ;;  %v656_v33 = vshll.u32 %v1325_v55, %v644_v43  ;;  %v653_v37 = vshll.u32 %v1324_v52, %v644_v43 }
  0xda   : > { %v572_v14 = vsel %vm570_vm10, %v571_v8, %v567_v42  ;;  %v429_v2 = vsel %vm1194_vm11, 0, %v1193_v7  ;;  %v648_v19 = vshrl.u32 %v1323_v48, %v645_v35  ;;  %v651_v21 = vshrl.u32 %v1324_v52, %v645_v35 }
  0xdb   : > { %v573_v15 = vadd.s32 %v572_v14, %v568_v11  ;;  %v430_v22 = vsub.s32 32, %v429_v2  ;;  %v434_v12 = vsub.s32 4294967266, %v429_v2  ;;  %v654_v23 = vshrl.u32 %v1325_v55, %v645_v35 }
  0xdc   : > { %v431_v44 = vshll.u32 %v422_v47, %v429_v2  ;;  %v1623_v25 = vshrl.u32 %v642_v5, 5  ;;  %v657_v50 = vshrl.u32 %v1326_v58, %v645_v35  ;;  %v659_v34 = vshll.u32 %v1326_v58, %v644_v43 }
  0xdd   : > { %v574_v24 = vadd.s32 536870912, %v573_v15  ;;  %v432_v26 = vshrl.u32 %v414_v1, %v430_v22  ;;  %v435_v27 = vadd.s32 127, %v434_v12  ;;  %v660_v38 = vshrl.u32 %v1327_v61, %v645_v35 }
  0xde   : > { %v649_v49 = vor.u32 %v648_v19, %v647_v13  ;;  %v1628_v39 = vor.u32 %v651_v21, %v650_v28  ;;  %v658_v51 = vor.u32 %v657_v50, %v656_v33  ;;  %v638_v32 = vor.u32 8388608, %v637_v18 }
  0xdf   : > { %v575_v41 = vshrl.u32 %v574_v24, 30  ;;  %v433_v53 = vor.u32 %v432_v26, %v431_v44  ;;  %v436_v54 = vshll.u32 %v435_v27, 23  ;;  %v655_v47 = vor.u32 %v654_v23, %v653_v37 }
  0xe0   : > { %v464_v45 = vadd.s32 3, %v447_v10  ;;  %v661_v36 = vor.u32 %v660_v38, %v659_v34  ;;  %vm662_vm12 = vcmp.lt.s32.totalorder %v1623_v25, 1  ;;  %vm665_vm13 = vcmp.lt.s32.totalorder %v1623_v25, 4 }
  0xe1   : > { %v576_v29 = vshll.u32 %v575_v41, 30  ;;  %v437_v30 = vor.u32 4788187, %v436_v54  ;;  %vm664_vm14 = vcmp.lt.s32.totalorder %v1623_v25, 3  ;;  %v670_v60 = vsel %vm662_vm12, %v649_v49, %v1628_v39 }
  0xe2   : > { %v671_v5 = vsel %vm665_vm13, %v658_v51, 920167782  ;;  %v440_v6 = vcvt.s32.f32 %v433_v53  ;;  %vm477_vm15 = vcmp.lt.s32.totalorder %v1437_v17, 0  ;;  %v1643_v43 = vshll.u32 %v638_v32, 8 }
  0xe3   : > { %v1632_v59 = vsub.s32 %v573_v15, %v576_v29  ;;  %v438_v0 = vand.u32 2147483647, %v437_v30  ;;  %v672_v42 = vsel %vm664_vm14, %v655_v47, %v671_v5  ;;  %vm663_vm2 = vcmp.lt.s32.totalorder %v1623_v25, 2 }
  0xe4   : > { %v1648_v7 = vmul.f32 6.2831855, %v275_v57  ;;  %v1652_v10 = vsel %vm663_vm2, %v670_v60, %v672_v42  ;;  %v674_v11 = vsel %vm662_vm12, %v1628_v39, %v655_v47  ;;  %v675_v18 = vsel %vm665_vm13, %v661_v36, 1326507024 }
  0xe5   : > { %vm578_vm0 = vcmp.lt.s32.totalorder %v1632_v59, 0  ;;  %v579_v1 = vsub.s32 0, %v1632_v59  ;;  %v441_v8 = vmul.f32 %v440_v6, %v438_v0  ;;  %v1659_v13 = vand.u32 3, %v464_v45 }
  0xe6   : > { %v646_v28 = vshrl.u32 %v1322_v46, %v645_v35  ;;  %v676_v33 = vsel %vm664_vm14, %v658_v51, %v675_v18  ;;  %v599_v19 = vsub.s32 4, %v575_v41  ;;  %v679_v22 = vand.u32 65535, %v1643_v43 }
  0xe7   : > { %v580_v14 = vsel %vm578_vm0, %v579_v1, %v1632_v59  ;;  %v442_v2 = vxor.u32 2147483648, %v441_v8  ;;  %v677_v21 = vsel %vm663_vm2, %v674_v11, %v676_v33  ;;  %v680_v12 = vshrl.u32 %v1643_v43, 16 }
  0xe8   : > { %v581_v15 = vclz %v580_v14  ;;  %v681_v37 = vand.u32 65535, %v677_v21  ;;  %v703_v23 = vand.u32 65535, %v1652_v10  ;;  %v682_v24 = vshrl.u32 %v677_v21, 16 }
  0xe9   : > { %v443_v44 = vsel %vm322_vm4, %v442_v2, %v441_v8  ;;  %v704_v50 = vshrl.u32 %v1652_v10, 16  ;;  %v569_v27 = vadd.s32 %v1597_v63, %v1595_v62  ;;  %v1680_v34 = vsel %vm662_vm12, %v646_v28, %v649_v49 }
  0xea   : > { %v1196_v35 = vadd.s32 4294967294, %v581_v15  ;;  %v446_v26 = vsel %vm1603_vm9, %v1435_v16, %v443_v44  ;;  %v1682_v38 = vmul.u32 %v681_v37, %v680_v12  ;;  %v667_v53 = vsel %vm665_vm13, %v655_v47, 2102212464 }
  0xeb   : > { %v448_v51 = vmul.f32 %v446_v26, %v446_v26  ;;  %v684_v54 = vmul.u32 %v682_v24, %v679_v22  ;;  %v1688_v31 = vsel %vm477_vm15, %v599_v19, %v575_v41  ;;  %v683_v45 = vmul.u32 %v681_v37, %v679_v22 }
  0xec   : > { %vm1197_vm3 = vcmp.lt.s32.totalorder %v1196_v35, 0  ;;  %v705_v29 = vmul.u32 %v703_v23, %v679_v22  ;;  %v706_v49 = vmul.u32 %v704_v50, %v679_v22  ;;  %v686_v57 = vmul.u32 %v682_v24, %v680_v12 }
  0xed   : > { %v584_v32 = vsel %vm1197_vm3, 0, %v1196_v35  ;;  %v449_v62 = vmul.f32 -0.001358992, %v448_v51  ;;  %v456_v63 = vmul.f32 -0.00019511016, %v448_v51  ;;  %v687_v60 = vshll.u32 %v684_v54, 16 }
  0xee   : > { %v585_v30 = vsub.s32 32, %v584_v32  ;;  %v589_v36 = vsub.s32 4294967266, %v584_v32  ;;  %v689_v5 = vshll.u32 %v1682_v38, 16  ;;  %v586_v47 = vshll.u32 %v1632_v59, %v584_v32 }
  0xef   : > { %v450_v0 = vadd.f32 0.041655596, %v449_v62  ;;  %v457_v6 = vadd.f32 0.008332121, %v456_v63  ;;  %vm691_vm4 = vc.u32 %v683_v45, %v687_v60  ;;  %v693_v41 = vadd.s32 %v687_v60, %v683_v45 }
  0xf0   : > { %v587_v42 = vshrl.u32 %v569_v27, %v585_v30  ;;  %v590_v1 = vadd.s32 127, %v589_v36  ;;  %v707_v8 = vmul.u32 %v703_v23, %v680_v12  ;;  %vm1694_vm5 = vcmp.le.f32.partialorder %v475_v20, 0.7853982 }
  0xf1   : > { %v451_v10 = vmul.f32 %v450_v0, %v448_v51  ;;  %v458_v11 = vmul.f32 %v457_v6, %v448_v51  ;;  %v692_v14 = vsel %vm691_vm4, 1, %v1328_v4  ;;  %v709_v28 = vshll.u32 %v706_v49, 16 }
  0xf2   : > { %v588_v33 = vor.u32 %v587_v42, %v586_v47  ;;  %v591_v2 = vshll.u32 %v590_v1, 23  ;;  %v694_v15 = vadd.s32 %v692_v14, %v686_v57  ;;  %vm695_vm6 = vc.u32 %v693_v41, %v689_v5 }
  0xf3   : > { %v452_v59 = vadd.f32 -0.4999988, %v451_v10  ;;  %v459_v19 = vadd.f32 -0.16666654, %v458_v11  ;;  %v688_v21 = vshrl.u32 %v684_v54, 16  ;;  %v696_v22 = vsel %vm695_vm6, 1, %v1328_v4 }
  0xf4   : > { %v592_v37 = vor.u32 4788187, %v591_v2  ;;  %v698_v23 = vadd.s32 %v696_v22, %v694_v15  ;;  %v708_v44 = vmul.u32 %v704_v50, %v680_v12  ;;  %v711_v35 = vshll.u32 %v707_v8, 16 }
  0xf5   : > { %v453_v20 = vmul.f32 %v452_v59, %v448_v51  ;;  %v460_v24 = vmul.f32 %v459_v19, %v448_v51  ;;  %vm713_vm7 = vc.u32 %v705_v29, %v709_v28  ;;  %v715_v27 = vadd.s32 %v709_v28, %v705_v29 }
  0xf6   : > { %v593_v32 = vand.u32 2147483647, %v592_v37  ;;  %v595_v45 = vcvt.s32.f32 %v588_v33  ;;  %v699_v62 = vadd.s32 %v698_v23, %v688_v21  ;;  %v714_v63 = vsel %vm713_vm7, 1, %v1328_v4 }
  0xf7   : > { %v461_v30 = vadd.f32 1.0, %v460_v24  ;;  %v668_v54 = vsel %vm664_vm14, %v1628_v39, %v667_v53  ;;  %v716_v36 = vadd.s32 %v714_v63, %v708_v44  ;;  %vm717_vm8 = vc.u32 %v715_v27, %v711_v35 }
  0xf8   : > { %v454_v57 = vadd.f32 1.0, %v453_v20  ;;  %vm466_vm9 = vcmp.lt.s32.totalorder %v1659_v13, 2  ;;  %v596_v12 = vmul.f32 %v595_v45, %v593_v32  ;;  %v690_v50 = vshrl.u32 %v1682_v38, 16 }
  0xf9   : > { %v718_v51 = vsel %vm717_vm8, 1, %v1328_v4  ;;  %v462_v29 = vmul.f32 %v461_v30, %v446_v26  ;;  %v710_v60 = vshrl.u32 %v706_v49, 16  ;;  %v308_v0 = vperm.slane %v1431_v9, 3 }
  0xfa   : > { %v720_v5 = vadd.s32 %v718_v51, %v716_v36  ;;  %vm467_vm10 = vcmp.eq.s32.totalorder %v1659_v13, 0  ;;  %v597_v6 = vxor.u32 2147483648, %v596_v12  ;;  %v602_v39 = vsel %vm1694_vm5, 0, %v1688_v31 }
  0xfb   : > { %v1712_v53 = vadd.s32 %v699_v62, %v690_v50  ;;  %v468_v47 = vxor.u32 2147483648, %v462_v29  ;;  %v712_v42 = vshrl.u32 %v707_v8, 16  ;;  %v1715_v38 = vadd.f32 %v308_v0, %v1648_v7 }
  0xfc   : > { %v721_v1 = vadd.s32 %v720_v5, %v710_v60  ;;  %v471_v26 = vxor.u32 2147483648, %v454_v57  ;;  %v598_v49 = vsel %vm477_vm15, %v597_v6, %v596_v12  ;;  %v669_v41 = vsel %vm663_vm2, %v1680_v34, %v668_v54  ;;  %v295_v34 = vpop.f32.mrf.mxu0 }
  0xfd   : > { %v719_v10 = vadd.s32 %v715_v27, %v711_v35  ;;  %vm470_vm11 = vcmp.eq.s32.totalorder %v1659_v13, 2  ;;  %v1726_v31 = vsel %vm1694_vm5, %v1437_v17, %v598_v49  ;;  %v785_v7 = vand.u32 2147483647, %v1715_v38 }
  0xfe   : > { %v722_v8 = vadd.s32 %v721_v1, %v712_v42  ;;  %v469_v11 = vsel %vm467_vm10, %v454_v57, %v468_v47  ;;  %v603_v14 = vmul.f32 %v1726_v31, %v1726_v31  ;;  %v788_v25 = vand.u32 2139095040, %v1715_v38 }
  0xff   : > { %vm725_vm12 = vc.u32 %v1712_v53, %v719_v10  ;;  %v619_v28 = vadd.s32 3, %v602_v39  ;;  %v723_v33 = vmul.u32 %v1643_v43, %v669_v41  ;;  %v792_v2 = vand.u32 8388607, %v785_v7 }
 0x100   : > { %v726_v18 = vadd.s32 1, %v722_v8  ;;  %v472_v15 = vsel %vm470_vm11, %v471_v26, %v462_v29  ;;  %v604_v59 = vmul.f32 -0.001358992, %v603_v14  ;;  %v611_v19 = vmul.f32 -0.00019511016, %v603_v14 }
 0x101   : > { %v789_v21 = vshrl.u32 %v788_v25, 23  ;;  %v473_v22 = vsel %vm466_vm9, %v469_v11, %v472_v15  ;;  %v302_v23 = vmul.f32 6.2831855, %v295_v34  ;;  %v309_v44 = vperm.slane %v1431_v9, 4 }
 0x102   : > { %v727_v37 = vsel %vm725_vm12, %v726_v18, %v722_v8  ;;  %v605_v35 = vadd.f32 0.041655596, %v604_v59  ;;  %v612_v20 = vadd.f32 0.008332121, %v611_v19  ;;  %vm463_vm13 = vweird.f32 %v1435_v16 }
 0x103   : > { %v728_v43 = vadd.s32 %v727_v37, %v723_v33  ;;  %v1201_v24 = vadd.s32 4294967169, %v789_v21  ;;  %v620_v27 = vand.u32 3, %v619_v28  ;;  %v793_v32 = vor.u32 8388608, %v792_v2 }
 0x104   : > { %v606_v45 = vmul.f32 %v605_v35, %v603_v14  ;;  %v613_v62 = vmul.f32 %v612_v20, %v603_v14  ;;  %v474_v13 = vsel %vm463_vm13, nan, %v473_v22  ;;  %v1743_v54 = vadd.f32 %v309_v44, %v302_v23 }
 0x105   : > { %v729_v63 = vadd.s32 536870912, %v728_v43  ;;  %v795_v30 = vadd.s32 1, %v1201_v24  ;;  %v1747_v50 = vshll.u32 %v793_v32, 8  ;;  %vm621_vm15 = vcmp.lt.s32.totalorder %v620_v27, 2  ;;  %1095 = vst [vmem:[%s1750_s17] sm:$0xff] %v474_v13 }
 0x106   : > { %v607_v36 = vadd.f32 -0.4999988, %v606_v45  ;;  %v614_v9 = vadd.f32 -0.16666654, %v613_v62  ;;  %vm632_vm0 = vcmp.lt.s32.totalorder %v1452_v40, 0  ;;  %vm618_vm2 = vweird.f32 %v1437_v17  ;;  %1100 = vst.msk [vmem:[%s1750_s17] sm:$0xff] %vm183_vm1, %v1411_v3 }
 0x107   : > { %v730_v57 = vshrl.u32 %v729_v63, 30  ;;  %vm796_vm14 = vcmp.gt.s32.totalorder %v795_v30, 0  ;;  %vm622_vm3 = vcmp.eq.s32.totalorder %v620_v27, 0  ;;  %vm625_vm4 = vcmp.eq.s32.totalorder %v620_v27, 2 }
 0x108   : > { %v797_v12 = vsel %vm796_vm14, %v795_v30, 0  ;;  %v608_v16 = vmul.f32 %v607_v36, %v603_v14  ;;  %v615_v51 = vmul.f32 %v614_v9, %v603_v14  ;;  %v943_v5 = vand.u32 2139095040, %v1743_v54 }
 0x109   : > { %v731_v29 = vshll.u32 %v730_v57, 30  ;;  %v799_v60 = vand.u32 31, %v797_v12  ;;  %v724_v39 = vadd.s32 %v719_v10, %v1712_v53  ;;  %vm1761_vm5 = vcmp.le.f32.partialorder %v630_v56, 0.7853982 }
 0x10a   : > { %v609_v0 = vadd.f32 1.0, %v608_v16  ;;  %v616_v6 = vadd.f32 1.0, %v615_v51  ;;  %v1766_v26 = vand.u32 65535, %v1747_v50  ;;  %v1769_v49 = vshrl.u32 %v1747_v50, 16 }
 0x10b   : > { %v732_v47 = vsub.s32 %v728_v43, %v731_v29  ;;  %v800_v1 = vsub.s32 32, %v799_v60  ;;  %v940_v3 = vand.u32 2147483647, %v1743_v54  ;;  %v754_v10 = vsub.s32 4, %v730_v57 }
 0x10c   : > { %v617_v41 = vmul.f32 %v616_v6, %v1726_v31  ;;  %v626_v8 = vxor.u32 2147483648, %v609_v0  ;;  %v802_v56 = vshll.u32 %v1322_v46, %v799_v60  ;;  %v805_v11 = vshll.u32 %v1323_v48, %v799_v60 }
 0x10d   : > { %vm733_vm6 = vcmp.lt.s32.totalorder %v732_v47, 0  ;;  %v734_v53 = vsub.s32 0, %v732_v47  ;;  %v944_v14 = vshrl.u32 %v943_v5, 23  ;;  %v803_v28 = vshrl.u32 %v1323_v48, %v800_v1 }
 0x10e   : > { %v623_v25 = vxor.u32 2147483648, %v617_v41  ;;  %v806_v33 = vshrl.u32 %v1324_v52, %v800_v1  ;;  %v627_v18 = vsel %vm625_vm4, %v626_v8, %v617_v41  ;;  %v1778_v15 = vshrl.u32 %v797_v12, 5 }
 0x10f   : > { %v735_v34 = vsel %vm733_vm6, %v734_v53, %v732_v47  ;;  %v808_v31 = vshll.u32 %v1324_v52, %v799_v60  ;;  %v809_v19 = vshrl.u32 %v1325_v55, %v800_v1  ;;  %v811_v21 = vshll.u32 %v1325_v55, %v799_v60 }
 0x110   : > { %v736_v2 = vclz %v735_v34  ;;  %v624_v59 = vsel %vm622_vm3, %v609_v0, %v623_v25  ;;  %v812_v22 = vshrl.u32 %v1326_v58, %v800_v1  ;;  %v755_v44 = vsel %vm632_vm0, %v754_v10, %v730_v57 }
 0x111   : > { %v628_v37 = vsel %vm621_vm15, %v624_v59, %v627_v18  ;;  %v1204_v35 = vadd.s32 4294967169, %v944_v14  ;;  %v804_v43 = vor.u32 %v803_v28, %v802_v56  ;;  %v807_v24 = vor.u32 %v806_v33, %v805_v11 }
 0x112   : > { %v1199_v23 = vadd.s32 4294967294, %v736_v2  ;;  %v629_v20 = vsel %vm618_vm2, nan, %v628_v37  ;;  %v813_v32 = vor.u32 %v812_v22, %v811_v21  ;;  %v810_v45 = vor.u32 %v809_v19, %v808_v31 }
 0x113   : > { %v814_v62 = vshll.u32 %v1326_v58, %v799_v60  ;;  %v815_v63 = vshrl.u32 %v1327_v61, %v800_v1  ;;  %1096 = vst [vmem:[%s1750_s17 + $0x8] sm:$0xff] %v629_v20  ;;  %v757_v30 = vsel %vm1761_vm5, 0, %v755_v44  ;;  %v801_v13 = vshrl.u32 %v1322_v46, %v800_v1 }
 0x114   : > { %vm1200_vm7 = vcmp.lt.s32.totalorder %v1199_v23, 0  ;;  %vm817_vm8 = vcmp.lt.s32.totalorder %v1778_v15, 1  ;;  %vm820_vm9 = vcmp.lt.s32.totalorder %v1778_v15, 4  ;;  %vm818_vm10 = vcmp.lt.s32.totalorder %v1778_v15, 2 }
 0x115   : > { %v739_v27 = vsel %vm1200_vm7, 0, %v1199_v23  ;;  %v816_v9 = vor.u32 %v815_v63, %v814_v62  ;;  %vm819_vm11 = vcmp.lt.s32.totalorder %v1778_v15, 3  ;;  %v825_v57 = vsel %vm817_vm8, %v804_v43, %v807_v24 }
 0x116   : > { %v740_v17 = vsub.s32 32, %v739_v27  ;;  %v744_v36 = vsub.s32 4294967266, %v739_v27  ;;  %v826_v12 = vsel %vm820_vm9, %v813_v32, 920167782  ;;  %v741_v16 = vshll.u32 %v732_v47, %v739_v27 }
 0x117   : > { %v827_v60 = vsel %vm819_vm11, %v810_v45, %v826_v12  ;;  %v822_v5 = vsel %vm820_vm9, %v810_v45, 2102212464  ;;  %v829_v6 = vsel %vm817_vm8, %v807_v24, %v810_v45  ;;  %v830_v1 = vsel %vm820_vm9, %v816_v9, 1326507024 }
 0x118   : > { %v742_v51 = vshrl.u32 %v724_v39, %v740_v17  ;;  %v745_v29 = vadd.s32 127, %v744_v36  ;;  %v828_v0 = vsel %vm818_vm10, %v825_v57, %v827_v60  ;;  %v831_v53 = vsel %vm819_vm11, %v813_v32, %v830_v1 }
 0x119   : > { %v858_v10 = vand.u32 65535, %v828_v0  ;;  %v832_v39 = vsel %vm818_vm10, %v829_v6, %v831_v53  ;;  %v859_v47 = vshrl.u32 %v828_v0, 16  ;;  %v1814_v56 = vand.u32 8388607, %v940_v3 }
 0x11a   : > { %v743_v41 = vor.u32 %v742_v51, %v741_v16  ;;  %v746_v8 = vshll.u32 %v745_v29, 23  ;;  %v950_v11 = vadd.s32 1, %v1204_v35  ;;  %v774_v25 = vadd.s32 3, %v757_v30 }
 0x11b   : > { %v836_v34 = vand.u32 65535, %v832_v39  ;;  %v837_v28 = vshrl.u32 %v832_v39, 16  ;;  %v821_v33 = vsel %vm817_vm8, %v801_v13, %v804_v43  ;;  %v823_v18 = vsel %vm819_vm11, %v807_v24, %v822_v5 }
 0x11c   : > { %v747_v14 = vor.u32 4788187, %v746_v8  ;;  %v861_v2 = vmul.u32 %v859_v47, %v1766_v26  ;;  %v862_v31 = vmul.u32 %v858_v10, %v1769_v49  ;;  %v750_v19 = vcvt.s32.f32 %v743_v41 }
 0x11d   : > { %v839_v21 = vmul.u32 %v837_v28, %v1766_v26  ;;  %v840_v22 = vmul.u32 %v836_v34, %v1769_v49  ;;  %v860_v37 = vmul.u32 %v858_v10, %v1766_v26  ;;  %v863_v23 = vmul.u32 %v859_v47, %v1769_v49 }
 0x11e   : > { %v748_v59 = vand.u32 2147483647, %v747_v14  ;;  %v864_v44 = vshll.u32 %v861_v2, 16  ;;  %vm951_vm12 = vcmp.gt.s32.totalorder %v950_v11, 0  ;;  %v838_v20 = vmul.u32 %v836_v34, %v1766_v26 }
 0x11f   : > { %v841_v43 = vmul.u32 %v837_v28, %v1769_v49  ;;  %v842_v24 = vshll.u32 %v839_v21, 16  ;;  %v844_v32 = vshll.u32 %v840_v22, 16  ;;  %v866_v45 = vshll.u32 %v862_v31, 16 }
 0x120   : > { %v751_v35 = vmul.f32 %v750_v19, %v748_v59  ;;  %vm868_vm13 = vc.u32 %v860_v37, %v864_v44  ;;  %v870_v62 = vadd.s32 %v864_v44, %v860_v37  ;;  %v865_v17 = vshrl.u32 %v861_v2, 16 }
 0x121   : > { %vm846_vm14 = vc.u32 %v838_v20, %v842_v24  ;;  %v848_v27 = vadd.s32 %v842_v24, %v838_v20  ;;  %v869_v30 = vsel %vm868_vm13, 1, %v1328_v4  ;;  %v952_v51 = vsel %vm951_vm12, %v950_v11, 0 }
 0x122   : > { %v752_v63 = vxor.u32 2147483648, %v751_v35  ;;  %v847_v13 = vsel %vm846_vm14, 1, %v1328_v4  ;;  %v871_v36 = vadd.s32 %v869_v30, %v863_v23  ;;  %vm872_vm15 = vc.u32 %v870_v62, %v866_v45 }
 0x123   : > { %v849_v9 = vadd.s32 %v847_v13, %v841_v43  ;;  %vm850_vm2 = vc.u32 %v848_v27, %v844_v32  ;;  %v873_v49 = vsel %vm872_vm15, 1, %v1328_v4  ;;  %v843_v60 = vshrl.u32 %v839_v21, 16 }
 0x124   : > { %v753_v26 = vsel %vm632_vm0, %v752_v63, %v751_v35  ;;  %v851_v12 = vsel %vm850_vm2, 1, %v1328_v4  ;;  %v875_v16 = vadd.s32 %v873_v49, %v871_v36  ;;  %v954_v0 = vand.u32 31, %v952_v51 }
 0x125   : > { %v756_v57 = vsel %vm1761_vm5, %v1452_v40, %v753_v26  ;;  %v853_v5 = vadd.s32 %v851_v12, %v849_v9  ;;  %v824_v6 = vsel %vm818_vm10, %v821_v33, %v823_v18  ;;  %v845_v1 = vshrl.u32 %v840_v22, 16 }
 0x126   : > { %v758_v29 = vmul.f32 %v756_v57, %v756_v57  ;;  %v867_v41 = vshrl.u32 %v862_v31, 16  ;;  %v876_v8 = vadd.s32 %v875_v16, %v865_v17  ;;  %v1840_v42 = vsub.s32 32, %v954_v0 }
 0x127   : > { %v854_v39 = vadd.s32 %v853_v5, %v843_v60  ;;  %v1842_v47 = vand.u32 3, %v774_v25  ;;  %v948_v11 = vor.u32 8388608, %v1814_v56  ;;  %v1847_v59 = vadd.s32 %v870_v62, %v866_v45 }
 0x128   : > { %v759_v53 = vmul.f32 -0.001358992, %v758_v29  ;;  %v766_v10 = vmul.f32 -0.00019511016, %v758_v29  ;;  %v877_v14 = vadd.s32 %v876_v8, %v867_v41  ;;  %v878_v15 = vmul.u32 %v1747_v50, %v824_v6 }
 0x129   : > { %v1845_v2 = vadd.s32 %v854_v39, %v845_v1  ;;  %v1850_v18 = vshrl.u32 %v952_v51, 5  ;;  %v957_v31 = vshll.u32 %v1322_v46, %v954_v0  ;;  %v958_v56 = vshrl.u32 %v1323_v48, %v1840_v42 }
 0x12a   : > { %v760_v34 = vadd.f32 0.041655596, %v759_v53  ;;  %v767_v28 = vadd.f32 0.008332121, %v766_v10  ;;  %v881_v33 = vadd.s32 1, %v877_v14  ;;  %v960_v22 = vshll.u32 %v1323_v48, %v954_v0 }
 0x12b   : > { %vm880_vm0 = vc.u32 %v1845_v2, %v1847_v59  ;;  %v961_v37 = vshrl.u32 %v1324_v52, %v1840_v42  ;;  %v964_v50 = vshrl.u32 %v1325_v55, %v1840_v42  ;;  %v963_v20 = vshll.u32 %v1324_v52, %v954_v0 }
 0x12c   : > { %v761_v19 = vmul.f32 %v760_v34, %v758_v29  ;;  %v768_v21 = vmul.f32 %v767_v28, %v758_v29  ;;  %v882_v25 = vsel %vm880_vm0, %v881_v33, %v877_v14  ;;  %v966_v43 = vshll.u32 %v1325_v55, %v954_v0 }
 0x12d   : > { %v883_v35 = vadd.s32 %v882_v25, %v878_v15  ;;  %v967_v24 = vshrl.u32 %v1326_v58, %v1840_v42  ;;  %v969_v32 = vshll.u32 %v1326_v58, %v954_v0  ;;  %v970_v48 = vshrl.u32 %v1327_v61, %v1840_v42 }
 0x12e   : > { %v762_v23 = vadd.f32 -0.4999988, %v761_v19  ;;  %v769_v44 = vadd.f32 -0.16666654, %v768_v21  ;;  %v1869_v27 = vor.u32 %v958_v56, %v957_v31  ;;  %v1871_v30 = vor.u32 %v961_v37, %v960_v22 }
 0x12f   : > { %v884_v63 = vadd.s32 536870912, %v883_v35  ;;  %v1873_v13 = vor.u32 %v964_v50, %v963_v20  ;;  %v968_v52 = vor.u32 %v967_v24, %v966_v43  ;;  %v971_v17 = vor.u32 %v970_v48, %v969_v32 }
 0x130   : > { %v763_v45 = vmul.f32 %v762_v23, %v758_v29  ;;  %v770_v62 = vmul.f32 %v769_v44, %v758_v29  ;;  %vm975_vm3 = vcmp.lt.s32.totalorder %v1850_v18, 4  ;;  %vm776_vm4 = vcmp.lt.s32.totalorder %v1842_v47, 2 }
 0x131   : > { %v1875_v26 = vshrl.u32 %v884_v63, 30  ;;  %vm972_vm5 = vcmp.lt.s32.totalorder %v1850_v18, 1  ;;  %v981_v58 = vsel %vm975_vm3, %v968_v52, 920167782  ;;  %vm974_vm6 = vcmp.lt.s32.totalorder %v1850_v18, 3 }
 0x132   : > { %v764_v55 = vadd.f32 1.0, %v763_v45  ;;  %v771_v36 = vadd.f32 1.0, %v770_v62  ;;  %vm780_vm7 = vcmp.eq.s32.totalorder %v1842_v47, 2  ;;  %v980_v12 = vsel %vm972_vm5, %v1869_v27, %v1871_v30 }
 0x133   : > { %v886_v49 = vshll.u32 %v1875_v26, 30  ;;  %v982_v16 = vsel %vm974_vm6, %v1873_v13, %v981_v58  ;;  %v985_v51 = vsel %vm975_vm3, %v971_v17, 1326507024  ;;  %v984_v60 = vsel %vm972_vm5, %v1871_v30, %v1873_v13 }
 0x134   : > { %v772_v61 = vmul.f32 %v771_v36, %v756_v57  ;;  %v781_v9 = vxor.u32 2147483648, %v764_v55  ;;  %v1898_v5 = vshll.u32 %v948_v11, 8  ;;  %vm777_vm8 = vcmp.eq.s32.totalorder %v1842_v47, 0 }
 0x135   : > { %v887_v29 = vsub.s32 %v883_v35, %v886_v49  ;;  %vm973_vm9 = vcmp.lt.s32.totalorder %v1850_v18, 2  ;;  %v986_v6 = vsel %vm974_vm6, %v968_v52, %v985_v51  ;;  %vm773_vm11 = vweird.f32 %v1452_v40 }
 0x136   : > { %v778_v57 = vxor.u32 2147483648, %v772_v61  ;;  %v782_v0 = vsel %vm780_vm7, %v781_v9, %v772_v61  ;;  %v983_v8 = vsel %vm973_vm9, %v980_v12, %v982_v16  ;;  %v987_v10 = vsel %vm973_vm9, %v984_v60, %v986_v6 }
 0x137   : > { %vm888_vm10 = vcmp.lt.s32.totalorder %v887_v29, 0  ;;  %v889_v41 = vsub.s32 0, %v887_v29  ;;  %v989_v11 = vand.u32 65535, %v1898_v5  ;;  %v991_v34 = vand.u32 65535, %v987_v10 }
 0x138   : > { %v779_v1 = vsel %vm777_vm8, %v764_v55, %v778_v57  ;;  %v992_v15 = vshrl.u32 %v987_v10, 16  ;;  %v1013_v33 = vand.u32 65535, %v983_v8  ;;  %v1014_v31 = vshrl.u32 %v983_v8, 16 }
 0x139   : > { %v783_v53 = vsel %vm776_vm4, %v779_v1, %v782_v0  ;;  %v890_v14 = vsel %vm888_vm10, %v889_v41, %v887_v29  ;;  %v990_v19 = vshrl.u32 %v1898_v5, 16  ;;  %v879_v47 = vadd.s32 %v1847_v59, %v1845_v2 }
 0x13a   : > { %v784_v39 = vsel %vm773_vm11, nan, %v783_v53  ;;  %v891_v28 = vclz %v890_v14  ;;  %v994_v40 = vmul.u32 %v992_v15, %v989_v11  ;;  %v1016_v25 = vmul.u32 %v1014_v31, %v989_v11 }
 0x13b   : > { %1097 = vst [vmem:[%s1750_s17 + $0x10] sm:$0xff] %v784_v39  ;;  %v995_v56 = vmul.u32 %v991_v34, %v990_v19  ;;  %v993_v22 = vmul.u32 %v991_v34, %v989_v11  ;;  %v1015_v50 = vmul.u32 %v1013_v33, %v989_v11  ;;  %v996_v44 = vmul.u32 %v992_v15, %v990_v19 }
 0x13c   : > { %v1202_v21 = vadd.s32 4294967294, %v891_v28  ;;  %v997_v37 = vshll.u32 %v994_v40, 16  ;;  %v1017_v35 = vmul.u32 %v1013_v33, %v990_v19  ;;  %v1019_v20 = vshll.u32 %v1016_v25, 16 }
 0x13d   : > { %v1018_v32 = vmul.u32 %v1014_v31, %v990_v19  ;;  %v999_v45 = vshll.u32 %v995_v56, 16  ;;  %v977_v12 = vsel %vm975_vm3, %v1873_v13, 2102212464  ;;  %v998_v16 = vshrl.u32 %v994_v40, 16 }
 0x13e   : > { %vm1203_vm12 = vcmp.lt.s32.totalorder %v1202_v21, 0  ;;  %vm1001_vm13 = vc.u32 %v993_v22, %v997_v37  ;;  %v1003_v63 = vadd.s32 %v997_v37, %v993_v22  ;;  %vm1023_vm14 = vc.u32 %v1015_v50, %v1019_v20 }
 0x13f   : > { %v894_v23 = vsel %vm1203_vm12, 0, %v1202_v21  ;;  %v1002_v62 = vsel %vm1001_vm13, 1, %v1328_v4  ;;  %v1021_v17 = vshll.u32 %v1017_v35, 16  ;;  %v1024_v55 = vsel %vm1023_vm14, 1, %v1328_v4 }
 0x140   : > { %v895_v43 = vsub.s32 32, %v894_v23  ;;  %v899_v24 = vsub.s32 4294967266, %v894_v23  ;;  %v896_v48 = vshll.u32 %v887_v29, %v894_v23  ;;  %v1004_v52 = vadd.s32 %v1002_v62, %v996_v44 }
 0x141   : > { %vm1005_vm15 = vc.u32 %v1003_v63, %v999_v45  ;;  %v1025_v36 = vadd.s32 %v1019_v20, %v1015_v50  ;;  %v1026_v49 = vadd.s32 %v1024_v55, %v1018_v32  ;;  %v956_v29 = vshrl.u32 %v1322_v46, %v1840_v42 }
 0x142   : > { %v897_v2 = vshrl.u32 %v879_v47, %v895_v43  ;;  %v900_v59 = vadd.s32 127, %v899_v24  ;;  %v1006_v9 = vsel %vm1005_vm15, 1, %v1328_v4  ;;  %v1000_v0 = vshrl.u32 %v995_v56, 16 }
 0x143   : > { %v1008_v51 = vadd.s32 %v1006_v9, %v1004_v52  ;;  %vm1027_vm2 = vc.u32 %v1025_v36, %v1021_v17  ;;  %v1020_v1 = vshrl.u32 %v1016_v25, 16  ;;  %v976_v10 = vsel %vm972_vm5, %v956_v29, %v1869_v27 }
 0x144   : > { %v898_v58 = vor.u32 %v897_v2, %v896_v48  ;;  %v901_v61 = vshll.u32 %v900_v59, 23  ;;  %v1028_v60 = vsel %vm1027_vm2, 1, %v1328_v4  ;;  %v978_v13 = vsel %vm974_vm6, %v1871_v30, %v977_v12 }
 0x145   : > { %v1009_v6 = vadd.s32 %v1008_v51, %v998_v16  ;;  %v1030_v41 = vadd.s32 %v1028_v60, %v1026_v49  ;;  %v1022_v14 = vshrl.u32 %v1017_v35, 16  ;;  %v1029_v42 = vadd.s32 %v1025_v36, %v1021_v17 }
 0x146   : > { %v902_v57 = vor.u32 4788187, %v901_v61  ;;  %v905_v53 = vcvt.s32.f32 %v898_v58  ;;  %v979_v4 = vsel %vm973_vm9, %v976_v10, %v978_v13  ;;  %vm787_vm3 = vcmp.lt.s32.totalorder %v1715_v38, 0 }
 0x147   : > { %v1010_v39 = vadd.s32 %v1009_v6, %v1000_v0  ;;  %v1031_v11 = vadd.s32 %v1030_v41, %v1020_v1  ;;  %vm1936_vm4 = vcmp.le.f32.partialorder %v785_v7, 0.7853982  ;;  %v1033_v33 = vmul.u32 %v1898_v5, %v979_v4 }
 0x148   : > { %v903_v8 = vand.u32 2147483647, %v902_v57  ;;  %v909_v31 = vsub.s32 4, %v1875_v26  ;;  %vm928_vm6 = vweird.f32 %v1715_v38  ;;  %vm942_vm11 = vcmp.lt.s32.totalorder %v1743_v54, 0 }
 0x149   : > { %v1032_v34 = vadd.s32 %v1031_v11, %v1022_v14  ;;  %vm1035_vm0 = vc.u32 %v1010_v39, %v1029_v42  ;;  %v1034_v16 = vadd.s32 %v1029_v42, %v1010_v39  ;;  %vm941_vm12 = vcmp.le.f32.partialorder %v940_v3, 0.7853982 }
 0x14a   : > { %v906_v46 = vmul.f32 %v905_v53, %v903_v8  ;;  %v910_v7 = vsel %vm787_vm3, %v909_v31, %v1875_v26  ;;  %vm1083_vm2 = vweird.f32 %v1743_v54 }
 0x14b   : > { %v1036_v15 = vadd.s32 1, %v1032_v34  ;;  %v912_v5 = vsel %vm1936_vm4, 0, %v910_v7 }
 0x14c   : > { %v907_v28 = vxor.u32 2147483648, %v906_v46  ;;  %v929_v32 = vadd.s32 3, %v912_v5 }
 0x14d   : > { %v1037_v19 = vsel %vm1035_vm0, %v1036_v15, %v1032_v34 }
 0x14e   : > { %v908_v30 = vsel %vm787_vm3, %v907_v28, %v906_v46  ;;  %v1038_v40 = vadd.s32 %v1037_v19, %v1033_v33  ;;  %v930_v59 = vand.u32 3, %v929_v32 }
 0x14f   : > { %v911_v18 = vsel %vm1936_vm4, %v1715_v38, %v908_v30 }
 0x150   : > { %v913_v21 = vmul.f32 %v911_v18, %v911_v18  ;;  %v1039_v25 = vadd.s32 536870912, %v1038_v40  ;;  %vm932_vm7 = vcmp.eq.s32.totalorder %v930_v59, 0  ;;  %vm935_vm8 = vcmp.eq.s32.totalorder %v930_v59, 2 }
 0x151   : > { %vm931_vm10 = vcmp.lt.s32.totalorder %v930_v59, 2 }
 0x152   : > { %v914_v47 = vmul.f32 -0.001358992, %v913_v21  ;;  %v921_v56 = vmul.f32 -0.00019511016, %v913_v21  ;;  %v1040_v50 = vshrl.u32 %v1039_v25, 30 }
 0x154   : > { %v915_v22 = vadd.f32 0.041655596, %v914_v47  ;;  %v922_v37 = vadd.f32 0.008332121, %v921_v56  ;;  %v1041_v35 = vshll.u32 %v1040_v50, 30  ;;  %v1064_v14 = vsub.s32 4, %v1040_v50 }
 0x156   : > { %v916_v23 = vmul.f32 %v915_v22, %v913_v21  ;;  %v923_v44 = vmul.f32 %v922_v37, %v913_v21  ;;  %v1042_v24 = vsub.s32 %v1038_v40, %v1041_v35  ;;  %v1065_v34 = vsel %vm942_vm11, %v1064_v14, %v1040_v50 }
 0x157   : > { %v1067_v27 = vsel %vm941_vm12, 0, %v1065_v34 }
 0x158   : > { %v917_v20 = vadd.f32 -0.4999988, %v916_v23  ;;  %v924_v43 = vadd.f32 -0.16666654, %v923_v44  ;;  %vm1043_vm5 = vcmp.lt.s32.totalorder %v1042_v24, 0  ;;  %v1044_v62 = vsub.s32 0, %v1042_v24 }
 0x159   : > { %v1084_v19 = vadd.s32 3, %v1067_v27 }
 0x15a   : > { %v918_v48 = vmul.f32 %v917_v20, %v913_v21  ;;  %v925_v45 = vmul.f32 %v924_v43, %v913_v21  ;;  %v1045_v26 = vsel %vm1043_vm5, %v1044_v62, %v1042_v24 }
 0x15b   : > { %v1046_v52 = vclz %v1045_v26  ;;  %v1085_v56 = vand.u32 3, %v1084_v19 }
 0x15c   : > { %v919_v63 = vadd.f32 1.0, %v918_v48  ;;  %v926_v2 = vadd.f32 1.0, %v925_v45 }
 0x15d   : > { %v1205_v36 = vadd.s32 4294967294, %v1046_v52  ;;  %vm1087_vm13 = vcmp.eq.s32.totalorder %v1085_v56, 0  ;;  %vm1090_vm14 = vcmp.eq.s32.totalorder %v1085_v56, 2  ;;  %vm1086_vm15 = vcmp.lt.s32.totalorder %v1085_v56, 2 }
 0x15e   : > { %v927_v17 = vmul.f32 %v926_v2, %v911_v18  ;;  %v936_v55 = vxor.u32 2147483648, %v919_v63 }
 0x15f   : > { %vm1206_vm9 = vcmp.lt.s32.totalorder %v1205_v36, 0 }
 0x160   : > { %v933_v58 = vxor.u32 2147483648, %v927_v17  ;;  %v937_v9 = vsel %vm935_vm8, %v936_v55, %v927_v17  ;;  %v1049_v49 = vsel %vm1206_vm9, 0, %v1205_v36 }
 0x161   : > { %v1050_v51 = vsub.s32 32, %v1049_v49  ;;  %v1054_v57 = vsub.s32 4294967266, %v1049_v49  ;;  %v1051_v60 = vshll.u32 %v1042_v24, %v1049_v49 }
 0x162   : > { %v934_v61 = vsel %vm932_vm7, %v919_v63, %v933_v58 }
 0x163   : > { %v938_v12 = vsel %vm931_vm10, %v934_v61, %v937_v9  ;;  %v1052_v0 = vshrl.u32 %v1034_v16, %v1050_v51  ;;  %v1055_v6 = vadd.s32 127, %v1054_v57 }
 0x164   : > { %v939_v29 = vsel %vm928_vm6, nan, %v938_v12 }
 0x165   : > { %1098 = vst [vmem:[%s1750_s17 + $0x18] sm:$0xff] %v939_v29  ;;  %v1053_v1 = vor.u32 %v1052_v0, %v1051_v60  ;;  %v1056_v41 = vshll.u32 %v1055_v6, 23 }
 0x167   : > { %v1057_v38 = vor.u32 4788187, %v1056_v41  ;;  %v1060_v53 = vcvt.s32.f32 %v1053_v1 }
 0x169   : > { %v1058_v8 = vand.u32 2147483647, %v1057_v38 }
 0x16b   : > { %v1061_v10 = vmul.f32 %v1060_v53, %v1058_v8 }
 0x16d   : > { %v1062_v13 = vxor.u32 2147483648, %v1061_v10 }
 0x16f   : > { %v1063_v39 = vsel %vm942_vm11, %v1062_v13, %v1061_v10 }
 0x170   : > { %v1066_v11 = vsel %vm941_vm12, %v1743_v54, %v1063_v39 }
 0x171   : > { %v1068_v46 = vmul.f32 %v1066_v11, %v1066_v11 }
 0x173   : > { %v1069_v42 = vmul.f32 -0.001358992, %v1068_v46  ;;  %v1076_v4 = vmul.f32 -0.00019511016, %v1068_v46 }
 0x175   : > { %v1070_v28 = vadd.f32 0.041655596, %v1069_v42  ;;  %v1077_v15 = vadd.f32 0.008332121, %v1076_v4 }
 0x177   : > { %v1071_v30 = vmul.f32 %v1070_v28, %v1068_v46  ;;  %v1078_v33 = vmul.f32 %v1077_v15, %v1068_v46 }
 0x179   : > { %v1072_v31 = vadd.f32 -0.4999988, %v1071_v30  ;;  %v1079_v18 = vadd.f32 -0.16666654, %v1078_v33 }
 0x17b   : > { %v1073_v3 = vmul.f32 %v1072_v31, %v1068_v46  ;;  %v1080_v21 = vmul.f32 %v1079_v18, %v1068_v46 }
 0x17d   : > { %v1074_v40 = vadd.f32 1.0, %v1073_v3  ;;  %v1081_v47 = vadd.f32 1.0, %v1080_v21 }
 0x17f   : > { %v1082_v25 = vmul.f32 %v1081_v47, %v1066_v11  ;;  %v1091_v7 = vxor.u32 2147483648, %v1074_v40 }
 0x181   : > { %v1088_v22 = vxor.u32 2147483648, %v1082_v25  ;;  %v1092_v50 = vsel %vm1090_vm14, %v1091_v7, %v1082_v25 }
 0x183   : > { %v1089_v37 = vsel %vm1087_vm13, %v1074_v40, %v1088_v22 }
 0x184   : > { %v1093_v5 = vsel %vm1086_vm15, %v1089_v37, %v1092_v50 }
 0x185   : > { %v1094_v23 = vsel %vm1083_vm2, nan, %v1093_v5 }
 0x186   : > { %1099 = vst.msk [vmem:[%s1750_s17 + $0x20] sm:$0xff] %vm183_vm1, %v1094_v23 }
 0x187   : > { %1285 = shalt.err (!%p1282_p3)
}
 0x188   : > { %1212 = dma.vmem_to_hbm [thread:$0]  (%p1387_p5), %s1116_s26, 640, %s1118_s27, %s1102_s16  }
 0x189 PF: > { %p1218_p4 = scmp.ge.s32.totalorder %s1320_s15, 2  ;;  %s1129_s8 = sand.u32 1, %s1308_s12  }
 0x18a   : > { %s1130_s9 = scalar_lea.sflag [#allocation3], %s1129_s8 }
 0x18b   : > { %p1215_p7 = pnand %p1218_p4, %p1391_p6 }
 0x18d   : > { %p1216_p8 = pneg %p1215_p7 }
 0x18f   : > { %1303 = dma.done.wait (%p1216_p8), %s1130_s9, 640  }
 0x190   : > { %1305 = vsyncadd (%p1216_p8), %s1130_s9, 4294966656  ;;  %p13_p9 = scmp.ge.s32.totalorder %s1374_s18, 4   ;;  %s2005_s12 = smov %s1312_s13 }
 0x191   : > { %s2006_s13 = smov %s1316_s14  ;;  %s2007_s14 = smov %s1385_s21 }
 0x192   : > { %s2008_s15 = smov %s1374_s18  ;;  %15 = sbr.rel (!%p13_p9) target bundleno = 3 (0x3), region = 69 }
 0x197   :  { %1136 = vsyncpa [#allocation3], 1 }
 0x198   :  { %1138 = vsyncpa [#allocation3 + $0x1], 1 }

</bundles_post_ra>
